<compile_context>
chip_gen: v6e
topology: v6e:2x2x1
jax: 0.10.0
libtpu: 0.0.40
codegen_flags: <defaults>
</compile_context>

<pallas_src>
import functools
import math

import jax
import jax.numpy as jnp
from jax import lax
from jax.experimental import pallas as pl
from jax.experimental.pallas import tpu as pltpu

_LANES = 128
_SUBLANE_ALIGN = 16           # bf16 (16,128) sublane packing; fine for f32 too
_MAX_BLOCK_ROWS = 4096        # 2 MiB / f32 operand / pipeline buffer
_NUM_CORE_SPLITS = 2          # v7x has 2 TensorCores; harmless (sequential) on v5e/v6e


def _msle_kernel(x_ref, t_ref, o_ref, acc_ref, *, scale, block_rows,
                 steps_per_split, rows_valid, acc_rows, need_mask):
    c = pl.program_id(0)          # core-split index  ("parallel")
    i = pl.program_id(1)          # reduction step    ("arbitrary")

    @pl.when(i == 0)
    def _():
        acc_ref[...] = jnp.zeros_like(acc_ref)

    # Stream native dtype; all math in f32.
    x = x_ref[...].astype(jnp.float32)
    t = t_ref[...].astype(jnp.float32)

    # One EUP log per element instead of two:
    #   log(|x|+1) - log(|t|+1) == log((|x|+1) / (|t|+1))
    # (full-precision divide = rcp + Newton refinement, cheaper than a second vlog).
    d = jnp.log((jnp.abs(x) + 1.0) / (jnp.abs(t) + 1.0))
    sq = d * d

    if need_mask:
        # Zero rows past the true (16-aligned) row count: ragged last block and any
        # phantom block on the second core split.  VPU-only work -> hidden.
        blk = c * steps_per_split + i
        row0 = blk * block_rows
        local = lax.broadcasted_iota(jnp.int32, sq.shape, 0)
        sq = jnp.where(row0 + local < rows_valid, sq, 0.0)

    # Wide elementwise accumulation (up to 8 independent accumulator vregs); no
    # cross-lane reduce in the hot loop.  Zero-padded elements contribute exactly 0.
    acc_ref[...] += jnp.sum(sq.reshape(-1, acc_rows, _LANES), axis=0)

    @pl.when(i == pl.num_programs(1) - 1)
    def _():
        total = jnp.sum(acc_ref[...])          # single XLU reduce, epilogue only
        o_ref[...] = jnp.full((1, 1, 1), total * scale, dtype=jnp.float32)


def msle_loss(prediction, target, reduction="mean"):
    """Pallas TPU implementation of MSLELoss.forward.  Returns a scalar f32."""
    if reduction not in ("mean", "sum"):
        # TODO(synk): reduction='none' (elementwise output tensor) not implemented.
        raise NotImplementedError("msle_loss supports reduction='mean' or 'sum'")

    x = prediction.reshape(-1)     # no upcast here: stream native dtype
    t = target.reshape(-1)
    n = x.shape[0]

    rows = -(-n // _LANES)                                      # ceil-div
    rows_aligned = -(-rows // _SUBLANE_ALIGN) * _SUBLANE_ALIGN
    n_aligned = rows_aligned * _LANES

    # Pad ONLY to the (16,128) tile alignment (exact for MSLE: padded zeros give
    # (log 1 - log 1)^2 == 0); never to a block multiple, so any size that is already
    # a multiple of 2048 incurs no HBM copy at all.
    if n_aligned != n:
        x = jnp.pad(x, (0, n_aligned - n))
        t = jnp.pad(t, (0, n_aligned - n))
    x = x.reshape(rows_aligned, _LANES)
    t = t.reshape(rows_aligned, _LANES)

    block_rows = min(_MAX_BLOCK_ROWS, rows_aligned)
    total_steps = -(-rows_aligned // block_rows)
    num_splits = _NUM_CORE_SPLITS if total_steps >= _NUM_CORE_SPLITS else 1
    steps_per_split = -(-total_steps // num_splits)
    # Mask needed iff gridded coverage exceeds the real (16-aligned) row count.
    need_mask = num_splits * steps_per_split * block_rows > rows_aligned
    acc_rows = math.gcd(block_rows, 64)        # block_rows is a multiple of 16
    max_blk = total_steps - 1

    scale = (1.0 / float(n)) if reduction == "mean" else 1.0
    kernel = functools.partial(
        _msle_kernel, scale=scale, block_rows=block_rows,
        steps_per_split=steps_per_split, rows_valid=rows_aligned,
        acc_rows=acc_rows, need_mask=need_mask)

    def in_map(c, i):
        # Clamp phantom blocks (odd step count on the 2nd split) onto a valid block;
        # their contribution is zeroed by the in-kernel mask.
        return (jnp.minimum(c * steps_per_split + i, max_blk), 0)

    elems = num_splits * steps_per_split * block_rows * _LANES
    cost = pl.CostEstimate(
        flops=8 * elems,                    # abs/add x2, divide, square, accumulate
        transcendentals=2 * elems,          # one log + one reciprocal per element
        bytes_accessed=int(x.size * x.dtype.itemsize
                           + t.size * t.dtype.itemsize + 4 * num_splits),
    )

    partials = pl.pallas_call(
        kernel,
        out_shape=jax.ShapeDtypeStruct((num_splits, 1, 1), jnp.float32),
        grid_spec=pltpu.PrefetchScalarGridSpec(
            num_scalar_prefetch=0,
            grid=(num_splits, steps_per_split),
            in_specs=[
                pl.BlockSpec((block_rows, _LANES), in_map),
                pl.BlockSpec((block_rows, _LANES), in_map),
            ],
            out_specs=pl.BlockSpec((1, 1, 1), lambda c, i: (c, 0, 0)),
            scratch_shapes=[pltpu.VMEM((acc_rows, _LANES), jnp.float32)],
        ),
        compiler_params=pltpu.CompilerParams(
            dimension_semantics=("parallel", "arbitrary"),
            vmem_limit_bytes=32 * 1024 * 1024,
        ),
        cost_estimate=cost,
    )(x, t)
    # Tiny cross-split reduction (at most 2 partials) outside the kernel.
    return jnp.sum(partials)


def _msle_ref(prediction, target, reduction="mean"):
    x = prediction.reshape(-1).astype(jnp.float32)
    t = target.reshape(-1).astype(jnp.float32)
    d = jnp.log(jnp.abs(x) + 1.0) - jnp.log(jnp.abs(t) + 1.0)
    sq = d * d
    return jnp.mean(sq) if reduction == "mean" else jnp.sum(sq)


if __name__ == "__main__":
    key = jax.random.PRNGKey(0)
    k1, k2, k3, k4, k5, k6 = jax.random.split(key, 6)

    # Small shapes consistent with holodec regression/conv outputs.
    B, C, H, W = 2, 4, 16, 16
    pred = jax.random.normal(k1, (B, C, H, W), dtype=jnp.float32) * 3.0
    targ = jax.random.normal(k2, (B, C, H, W), dtype=jnp.float32) * 3.0

    loss = jax.block_until_ready(msle_loss(pred, targ))
    ref = _msle_ref(pred, targ)
    assert jnp.allclose(loss, ref, rtol=3e-5, atol=1e-6), (loss, ref)

    # 'sum' reduction path.
    loss_s = jax.block_until_ready(msle_loss(pred, targ, reduction="sum"))
    ref_s = _msle_ref(pred, targ, reduction="sum")
    assert jnp.allclose(loss_s, ref_s, rtol=3e-5, atol=1e-3), (loss_s, ref_s)

    # Ragged size (zero-padded 16x128 tail) + bf16 native-dtype streaming.
    pred_r = jax.random.normal(k3, (3, 5, 7), dtype=jnp.bfloat16)
    targ_r = jax.random.normal(k4, (3, 5, 7), dtype=jnp.bfloat16)
    loss_r = jax.block_until_ready(msle_loss(pred_r, targ_r))
    ref_r = _msle_ref(pred_r, targ_r)
    assert jnp.allclose(loss_r, ref_r, rtol=1e-2, atol=1e-3), (loss_r, ref_r)

    # Multi-block ragged size: exercises the 2-way core split, the in-kernel tail
    # mask and the phantom-block clamp (no padding to a block multiple).
    pred_m = jax.random.normal(k5, (1000003,), dtype=jnp.float32)
    targ_m = jax.random.normal(k6, (1000003,), dtype=jnp.float32)
    loss_m = jax.block_until_ready(msle_loss(pred_m, targ_m))
    ref_m = _msle_ref(pred_m, targ_m)
    assert jnp.allclose(loss_m, ref_m, rtol=1e-4, atol=1e-6), (loss_m, ref_m)

    print("KERNEL_OK")
</pallas_src>

<mosaic_0001>
module attributes {stable_mosaic.version = 11 : i64} {
  func.func @_msle_kernel(%arg0: i32, %arg1: i32, %arg2: memref<16x128xf32, #tpu.memory_space<vmem>>, %arg3: memref<16x128xf32, #tpu.memory_space<vmem>>, %arg4: memref<1x1x1xf32, #tpu.memory_space<vmem>>, %arg5: memref<16x128xf32, #tpu.memory_space<vmem>>) attributes {dimension_semantics = [#tpu.dimension_semantics<parallel>, #tpu.dimension_semantics<arbitrary>], iteration_bounds = array<i64: 1, 1>, scalar_prefetch = 0 : i64, scratch_operands = 1 : i64, tpu.core_type = #tpu.core_type<tc>, window_params = [{transform_indices = @transform_0, window_bounds = array<i64: 16, 128>}, {transform_indices = @transform_1, window_bounds = array<i64: 16, 128>}, {transform_indices = @transform_2, window_bounds = array<i64: 1, 1, 1>}]} {
    %c0_i32 = arith.constant 0 : i32
    %0 = arith.cmpi eq, %arg1, %c0_i32 : i32
    %1 = arith.extui %0 : i1 to i32
    %c0_i32_0 = arith.constant 0 : i32
    %2 = arith.cmpi ne, %1, %c0_i32_0 : i32
    scf.if %2 {
      %cst_12 = arith.constant 0.000000e+00 : f32
      %22 = vector.broadcast %cst_12 : f32 to vector<16x128xf32>
      %c0_13 = arith.constant 0 : index
      %c0_14 = arith.constant 0 : index
      %23 = vector.load %arg5[%c0_13, %c0_14] : memref<16x128xf32, #tpu.memory_space<vmem>>, vector<16x128xf32>
      tpu.vector_store %arg5[%c0_13, %c0_14], %22 {strides = array<i32>} : memref<16x128xf32, #tpu.memory_space<vmem>>, vector<16x128xf32>,
    } else {
    }
    %c0 = arith.constant 0 : index
    %c0_1 = arith.constant 0 : index
    %3 = vector.load %arg2[%c0, %c0_1] : memref<16x128xf32, #tpu.memory_space<vmem>>, vector<16x128xf32>
    %c0_2 = arith.constant 0 : index
    %c0_3 = arith.constant 0 : index
    %4 = vector.load %arg3[%c0_2, %c0_3] : memref<16x128xf32, #tpu.memory_space<vmem>>, vector<16x128xf32>
    %5 = math.absf %3 : vector<16x128xf32>
    %cst = arith.constant 1.000000e+00 : f32
    %6 = vector.broadcast %cst : f32 to vector<16x128xf32>
    %7 = arith.addf %5, %6 : vector<16x128xf32>
    %8 = math.absf %4 : vector<16x128xf32>
    %cst_4 = arith.constant 1.000000e+00 : f32
    %9 = vector.broadcast %cst_4 : f32 to vector<16x128xf32>
    %10 = arith.addf %8, %9 : vector<16x128xf32>
    %11 = arith.divf %7, %10 : vector<16x128xf32>
    %12 = math.log %11 : vector<16x128xf32>
    %13 = arith.mulf %12, %12 : vector<16x128xf32>
    %c0_5 = arith.constant 0 : index
    %c0_6 = arith.constant 0 : index
    %14 = vector.load %arg5[%c0_5, %c0_6] : memref<16x128xf32, #tpu.memory_space<vmem>>, vector<16x128xf32>
    %15 = vector.shape_cast %13 : vector<16x128xf32> to vector<1x16x128xf32>
    %cst_7 = arith.constant dense<0.000000e+00> : vector<16x128xf32>
    %16 = vector.multi_reduction <add>, %15, %cst_7 [0] : vector<1x16x128xf32> to vector<16x128xf32>
    %17 = arith.addf %14, %16 : vector<16x128xf32>
    %c0_8 = arith.constant 0 : index
    %c0_9 = arith.constant 0 : index
    %18 = vector.load %arg5[%c0_8, %c0_9] : memref<16x128xf32, #tpu.memory_space<vmem>>, vector<16x128xf32>
    tpu.vector_store %arg5[%c0_8, %c0_9], %17 {strides = array<i32>} : memref<16x128xf32, #tpu.memory_space<vmem>>, vector<16x128xf32>,
    %c0_i32_10 = arith.constant 0 : i32
    %19 = arith.cmpi eq, %arg1, %c0_i32_10 : i32
    %20 = arith.extui %19 : i1 to i32
    %c0_i32_11 = arith.constant 0 : i32
    %21 = arith.cmpi ne, %20, %c0_i32_11 : i32
    scf.if %21 {
      %c0_12 = arith.constant 0 : index
      %c0_13 = arith.constant 0 : index
      %22 = vector.load %arg5[%c0_12, %c0_13] : memref<16x128xf32, #tpu.memory_space<vmem>>, vector<16x128xf32>
      %23 = vector.shape_cast %22 : vector<16x128xf32> to vector<1x16x128xf32>
      %cst_14 = arith.constant dense<0.000000e+00> : vector<1xf32>
      %24 = vector.multi_reduction <add>, %23, %cst_14 [1, 2] : vector<1x16x128xf32> to vector<1xf32>
      %25 = vector.shape_cast %24 : vector<1xf32> to vector<1x1x1xf32>
      %26 = vector.extract %25[0, 0, 0] : f32 from vector<1x1x1xf32>
      %cst_15 = arith.constant 4.8828125E-4 : f32
      %27 = arith.mulf %26, %cst_15 : f32
      %28 = vector.broadcast %27 : f32 to vector<1x1x1xf32>
      %c0_16 = arith.constant 0 : index
      %c0_17 = arith.constant 0 : index
      %c0_18 = arith.constant 0 : index
      %29 = vector.load %arg4[%c0_16, %c0_17, %c0_18] : memref<1x1x1xf32, #tpu.memory_space<vmem>>, vector<1x1x1xf32>
      tpu.vector_store %arg4[%c0_16, %c0_17, %c0_18], %28 {strides = array<i32>} : memref<1x1x1xf32, #tpu.memory_space<vmem>>, vector<1x1x1xf32>,
    } else {
    }
    return
  }
  func.func @transform_0(%arg0: i32, %arg1: i32) -> (i32, i32) {
    %c1_i32 = arith.constant 1 : i32
    %0 = arith.muli %arg0, %c1_i32 : i32
    %1 = arith.addi %0, %arg1 : i32
    %c0_i32 = arith.constant 0 : i32
    %2 = arith.minsi %1, %c0_i32 : i32
    %c0_i32_0 = arith.constant 0 : i32
    %c0_i32_1 = arith.constant 0 : i32
    return %2, %c0_i32_0 : i32, i32
  }
  func.func @transform_1(%arg0: i32, %arg1: i32) -> (i32, i32) {
    %c1_i32 = arith.constant 1 : i32
    %0 = arith.muli %arg0, %c1_i32 : i32
    %1 = arith.addi %0, %arg1 : i32
    %c0_i32 = arith.constant 0 : i32
    %2 = arith.minsi %1, %c0_i32 : i32
    %c0_i32_0 = arith.constant 0 : i32
    %c0_i32_1 = arith.constant 0 : i32
    return %2, %c0_i32_0 : i32, i32
  }
  func.func @transform_2(%arg0: i32, %arg1: i32) -> (i32, i32, i32) {
    %c0_i32 = arith.constant 0 : i32
    %c0_i32_0 = arith.constant 0 : i32
    %c0_i32_1 = arith.constant 0 : i32
    return %arg0, %c0_i32, %c0_i32_0 : i32, i32, i32
  }
}

</mosaic_0001>

<bundles_post_ra>
// kernel: tpu_custom_call.1
= control target key start
LH: loop header
LB: loop body
LE: loop exit
PB: predicated region body
PF: predicated region fallthrough
CT: control target
= control target key end

     0   :  { %7 = vsyncpa [#allocation4], 0  ;;  %s245_s0 = inlined_call_operand.hbm [shape: f32[16,128], index: 0, kind: input, shape index: {}]   ;;  %s246_s1 = inlined_call_operand.hbm [shape: f32[16,128], index: 1, kind: input, shape index: {}]   ;;  %s247_s2 = inlined_call_operand.hbm [shape: f32[1,1,1], index: 2, kind: output, shape index: {}]  }
   0x1   :  { %8 = vsyncpa [#allocation7], 0 }
   0x2   :  { %9 = vsyncpa [#allocation5], 0  ;;  %s216_s9 = smov [#allocation3]  }
   0x3   :  { %s21_s10 = sshll.u32 %s216_s9, 4  ;;  %s22_s10 = int_to_ptr.vmem [resolvable:$true] %s21_s10 }
   0x4   :  { %s158_s11 = scalar_lea.vmem %s22_s10, 256  ;;  %p163_p1 = scmp.lt.s32.totalorder %s22_s10, %s22_s10 }
   0x5   :  { %p159_p0 = scmp.ne.s32.totalorder %s22_s10, %s158_s11  ;;  %p164_p2 = scmp.lt.s32.totalorder %s158_s11, %s158_s11 }
   0x7   :  { %p165_p3 = por %p164_p2, %p163_p1 }
   0x9   :  { %p166_p4 = pnand %p165_p3, %p159_p0 }
   0xb   :  { %169 = shalt.err (!%p166_p4)
}
   0xc   :  { %s217_s12 = smov 128   ;;  %s218_s13 = smov 8  }
   0xd   :  { %27 = dma.hbm_to_vmem [thread:$0]  %s245_s0, 256, %s22_s10, [#allocation4], %s217_s12, %s217_s12, %s218_s13  }
   0xe   :  { %s219_s16 = smov [#allocation6]  }
   0xf   :  { %s39_s17 = sshll.u32 %s219_s16, 4  ;;  %s40_s17 = int_to_ptr.vmem [resolvable:$true] %s39_s17 }
  0x10   :  { %s178_s18 = scalar_lea.vmem %s40_s17, 256  ;;  %p183_p6 = scmp.lt.s32.totalorder %s40_s17, %s40_s17 }
  0x11   :  { %p179_p5 = scmp.ne.s32.totalorder %s40_s17, %s178_s18  ;;  %p184_p7 = scmp.lt.s32.totalorder %s178_s18, %s178_s18 }
  0x13   :  { %p185_p8 = por %p184_p7, %p183_p6 }
  0x15   :  { %p186_p9 = pnand %p185_p8, %p179_p5 }
  0x17   :  { %189 = shalt.err (!%p186_p9)
}
  0x18   :  { %45 = dma.hbm_to_vmem [thread:$0]  %s246_s1, 256, %s40_s17, [#allocation7], %s217_s12, %s217_s12, %s218_s13  }
  0x19   :  { %210 = dma.done.wait [#allocation4], 256  }
  0x1a   :  { %211 = vsyncadd [#allocation4], 4294967040 }
  0x1b   :  { %212 = dma.done.wait [#allocation7], 256  }
  0x1c   :  { %213 = vsyncadd [#allocation7], 4294967040  ;;  %v68_v0 = vld [vmem:[#allocation6] sm:$0xff]  ;;  %v69_v1 = vld [vmem:[#allocation6 + $0x8] sm:$0xff]  ;;  %s220_s0 = smov [#allocation8]   ;;  %vm113_vm0 = vcmask 0  }
  0x1d   :  { %v74_v2 = vand.u32 2147483647, %v68_v0  ;;  %v75_v3 = vand.u32 2147483647, %v69_v1  ;;  %v66_v6 = vld [vmem:[#allocation3] sm:$0xff]  ;;  %v67_v7 = vld [vmem:[#allocation3 + $0x8] sm:$0xff] }
  0x1e   :  { %v70_v8 = vand.u32 2147483647, %v66_v6  ;;  %v71_v9 = vand.u32 2147483647, %v67_v7  ;;  %s121_s1 = sshll.u32 %s220_s0, 4  ;;  %s122_s1 = int_to_ptr.vmem [resolvable:$true] %s121_s1 }
  0x1f   :  { %v76_v4 = vadd.f32 1.0, %v74_v2  ;;  %v77_v5 = vadd.f32 1.0, %v75_v3  ;;  %s190_s23 = scalar_lea.vmem %s122_s1, 16  ;;  %s194_s24 = scalar_lea.vmem %s122_s1, 32 }
  0x20   :  { %v72_v10 = vadd.f32 1.0, %v70_v8  ;;  %v73_v11 = vadd.f32 1.0, %v71_v9  ;;  %p191_p10 = scmp.ne.s32.totalorder %s122_s1, %s190_s23  ;;  %p195_p11 = scmp.lt.s32.totalorder %s122_s1, %s122_s1 }
  0x21   :  { %142 = vrcp.f32 %v76_v4  ;;  %p196_p12 = scmp.lt.s32.totalorder %s194_s24, %s190_s23 }
  0x22   :  { %144 = vrcp.f32 %v77_v5 }
  0x23   :  { %p197_p13 = por %p196_p12, %p195_p11 }
  0x25   :  { %p198_p0 = pnand %p197_p13, %p191_p10 }
  0x2e   :  { %v143_v12 = vpop.eup %142 }
  0x2f   :  { %v145_v13 = vpop.eup %144  ;;  %v79_v14 = vmul.f32 %v143_v12, %v72_v10 }
  0x30   :  { %v81_v15 = vmul.f32 %v145_v13, %v73_v11 }
  0x31   :  { %146 = vlog2.f32 %v79_v14 }
  0x32   :  { %148 = vlog2.f32 %v81_v15 }
  0x3e   :  { %v147_v16 = vpop.eup %146 }
  0x3f   :  { %v149_v17 = vpop.eup %148  ;;  %v83_v18 = vmul.f32 0.6931472, %v147_v16 }
  0x40   :  { %v85_v19 = vmul.f32 0.6931472, %v149_v17 }
  0x41   :  { %v86_v20 = vmul.f32 %v83_v18, %v83_v18 }
  0x42   :  { %v87_v21 = vmul.f32 %v85_v19, %v85_v19 }
  0x44   :  { %v101_v22 = vadd.f32 %v87_v21, %v86_v20 }
  0x46   :  { %102 = vadd.xlane.f32.xlu0 %v101_v22 }
  0xcf   :  { %v103_v23 = vpop.xlane.xlu0 %102 }
  0xd0   :  { %v104_v24 = vrot.slane %v103_v23, 4 }
  0xd2   :  { %v105_v25 = vadd.f32 %v104_v24, %v103_v23 }
  0xd4   :  { %v106_v26 = vrot.slane %v105_v25, 2 }
  0xd6   :  { %v107_v27 = vadd.f32 %v106_v26, %v105_v25 }
  0xd8   :  { %v108_v28 = vrot.slane %v107_v27, 1 }
  0xda   :  { %v109_v29 = vadd.f32 %v108_v28, %v107_v27 }
  0xdc   :  { %135 = vpush %v109_v29 }
 0x10d   :  { %s136_s21 = spop %135 }
 0x10e   :  { %s111_s22 = smul.f32 0.00048828125, %s136_s21 }
 0x110   :  { %v112_v30 = vstv %s111_s22 }
 0x111   :  { %114 = vst.msk [vmem:[#allocation8] sm:$0x1] %vm113_vm0, %v112_v30 }
 0x112   :  { %201 = shalt.err (!%p198_p0)
}
 0x113   :  { %124 = dma.vmem_to_hbm [thread:$0]  %s122_s1, 16, %s247_s2, [#allocation5]  }
 0x114   :  { %214 = dma.done.wait [#allocation5], 16  }
 0x115   :  { %215 = vsyncadd [#allocation5], 4294967280 }
 0x116   :  { %128 = vsyncpa [#allocation4], 1 }
 0x117   :  { %129 = vsyncpa [#allocation7], 1 }
 0x118   :  { %130 = vsyncpa [#allocation5], 1 }

</bundles_post_ra>
